<compile_context>
chip_gen: v5e
topology: v5e:2x2
jax: 0.10.0
libtpu: 0.0.40
codegen_flags: <defaults>
</compile_context>

<pallas_src>
import functools

import jax
import jax.numpy as jnp
from jax.experimental import pallas as pl
from jax.experimental.pallas import tpu as pltpu


def _space_proj_kernel(x_ref, w_ref, wc_ref, bc_ref, cs_ref, logits_ref, *,
                       tb, seq, inv_seq, n_concepts, n_latent):
    """One grid step handles `tb` whole sequences (tb*seq activation rows).

    x_ref      : [tm, E]            activation rows for this tile
    w_ref      : [E, C*L]           fused concept-space weights (grid-invariant)
    wc_ref     : [C*L, C_out]       classifier weight (transposed, grid-invariant)
    bc_ref     : [1, C_out]         classifier bias
    cs_ref     : [C, tm, L]         output: concept spaces in module layout
    logits_ref : [1, tb, C_out]     output: classifier logits for this tile (f32)
    """
    x = x_ref[...]                                                    # [tm, E]
    proj = jnp.tanh(
        jnp.dot(x, w_ref[...], preferred_element_type=jnp.float32))  # [tm, C*L] f32

    # Concept spaces written directly in the module's [C, rows, L] layout —
    # no second HBM pass (wrapper transpose) over the largest tensor.
    for c in range(n_concepts):
        cs_ref[c] = proj[:, c * n_latent:(c + 1) * n_latent].astype(cs_ref.dtype)

    # Per-sequence mean = sum * (1/S) (static scale), then the tiny fused
    # classifier head.  Accumulation stays in f32.
    mean = proj.reshape(tb, seq, n_concepts * n_latent).sum(axis=1) * inv_seq  # [tb, C*L]
    logits = jnp.dot(mean, wc_ref[...], preferred_element_type=jnp.float32) + bc_ref[...]
    logits_ref[0] = logits


def prepare_space_weights(w_spaces):
    """[C, L, E] (torch Linear weights) -> fused [E, C*L]. Call ONCE, outside jit."""
    c, l, e = w_spaces.shape
    return jnp.transpose(w_spaces, (2, 0, 1)).reshape(e, c * l)


def _vmem_capacity_bytes():
    try:
        return int(pltpu.get_tpu_info().vmem_capacity_bytes)
    except Exception:
        return 64 * 1024 * 1024  # conservative: v7x has 64 MiB per TensorCore


def _pick_block_b(B, S, E, CL, act_itemsize, w_itemsize, vmem_cap):
    """Largest number of whole sequences per tile that fits the VMEM budget."""
    budget = int(vmem_cap * 0.75)                      # leave compiler headroom
    fixed = 2 * E * CL * w_itemsize + (1 << 20)        # weights + slack
    # Per activation row: double-buffered x + cs tiles, plus the f32 proj tile.
    per_row = 2 * (E + CL) * act_itemsize + CL * 4
    row_cap = max(S, (budget - fixed) // per_row)

    block_b = 1
    for cand in range(B, 0, -1):
        if B % cand == 0 and cand * S <= row_cap:
            block_b = cand
            break
    # v7x has 2 TensorCores: prefer an even tile count >= 2 when each half
    # still moves plenty of data (>= ~4096 rows amortizes the per-step cost).
    if B // block_b == 1 and B % 2 == 0 and (B // 2) * S >= 4096:
        block_b = B // 2
    return block_b


@functools.partial(jax.jit, static_argnames=("n_concept_spaces", "n_latent", "block_b"))
def space_model_for_seq_classification(embed, w_all, w_cls, b_cls, *,
                                       n_concept_spaces, n_latent, block_b=None):
    """embed: [B,S,E]; w_all: [E, C*L] (from prepare_space_weights);
    w_cls: [C_out, C*L]; b_cls: [C_out].

    Returns (loss, logits [B, C_out] f32, concept_spaces [C, B, S, L]) —
    labels=None path, so loss == 0.0 as in the PyTorch forward.
    """
    B, S, E = embed.shape
    C, L = n_concept_spaces, n_latent
    CL = C * L
    C_out = w_cls.shape[0]
    assert w_all.shape == (E, CL)

    act_itemsize = jnp.dtype(embed.dtype).itemsize
    w_itemsize = jnp.dtype(w_all.dtype).itemsize
    vmem_cap = _vmem_capacity_bytes()

    if block_b is None:
        block_b = _pick_block_b(B, S, E, CL, act_itemsize, w_itemsize, vmem_cap)
    assert B % block_b == 0, "block_b must divide the batch"
    tb = block_b
    tm = tb * S                       # rows per tile (whole sequences only)
    num_tiles = B // tb

    # The in-kernel per-sequence reshape splits the sublane axis; S must sit on
    # an 8-row boundary (proj is f32) unless the tile holds a single sequence.
    assert tb == 1 or S % 8 == 0, "sequence length must be a multiple of 8"
    # TODO(synk): add a strided-accumulation fallback for S % 8 != 0.

    x2d = embed.reshape(B * S, E)                       # row-major -> free reshape
    w_cls_t = w_cls.astype(jnp.float32).T               # [CL, C_out], tiny
    b_cls2 = b_cls.astype(jnp.float32).reshape(1, C_out)

    # Generation-aware VMEM request derived from the actual tile plan.
    needed = (2 * tm * (E + CL) * act_itemsize + tm * CL * 4
              + 2 * E * CL * w_itemsize + (1 << 20))
    vmem_limit = int(min(int(vmem_cap * 0.75), max(2 * needed, 16 * 1024 * 1024)))

    kernel = functools.partial(_space_proj_kernel, tb=tb, seq=S, inv_seq=1.0 / S,
                               n_concepts=C, n_latent=L)

    cs, logits_tiles = pl.pallas_call(
        kernel,
        out_shape=(
            jax.ShapeDtypeStruct((C, B * S, L), embed.dtype),     # module layout
            jax.ShapeDtypeStruct((num_tiles, tb, C_out), jnp.float32),
        ),
        grid_spec=pl.GridSpec(
            grid=(num_tiles,),
            in_specs=[
                pl.BlockSpec((tm, E), lambda i: (i, 0)),          # activation row tile
                pl.BlockSpec((E, CL), lambda i: (0, 0)),          # fused space weights
                pl.BlockSpec((CL, C_out), lambda i: (0, 0)),      # classifier weight
                pl.BlockSpec((1, C_out), lambda i: (0, 0)),       # classifier bias
            ],
            out_specs=[
                pl.BlockSpec((C, tm, L), lambda i: (0, i, 0)),
                pl.BlockSpec((1, tb, C_out), lambda i: (i, 0, 0)),
            ],
        ),
        compiler_params=pltpu.CompilerParams(
            dimension_semantics=("parallel",),                     # shards across v7x TCs
            vmem_limit_bytes=vmem_limit),
    )(x2d, w_all, w_cls_t, b_cls2)

    logits = logits_tiles.reshape(B, C_out)            # f32, free reshape
    concept_spaces = cs.reshape(C, B, S, L)            # free reshape (no transpose pass)

    loss = jnp.float32(0.0)  # labels=None path
    # TODO(synk): losses.inter_space_loss / losses.intra_space_loss are not defined in
    # the provided module, so the labeled cross-entropy + regularizer branch is omitted.
    return loss, logits, concept_spaces


def base_model_last_hidden_state(emb_table, input_ids, attention_mask):
    """Synthetic 'base model' (glue, plain JAX): embedding lookup gated by the mask."""
    h = emb_table[input_ids]                                          # [B, S, E]
    return h * attention_mask[..., None].astype(h.dtype)


if __name__ == "__main__":
    # Small, module-consistent shapes.
    B, S = 8, 16           # batch, sequence length
    E = 32                 # n_embed
    L = 16                 # n_latent
    C = 2                  # n_concept_spaces
    VOCAB = 50

    key = jax.random.PRNGKey(0)
    k_emb, k_ids, k_w, k_wc, k_bc = jax.random.split(key, 5)

    emb_table = jax.random.normal(k_emb, (VOCAB, E), jnp.float32) * 0.05
    input_ids = jax.random.randint(k_ids, (B, S), 0, VOCAB)
    attention_mask = jnp.ones((B, S), jnp.int32)

    # SpaceModel: C Linear(E -> L, bias=False) weights, torch-style U(-1/sqrt(E), 1/sqrt(E))
    bound_w = 1.0 / jnp.sqrt(jnp.float32(E))
    w_spaces = jax.random.uniform(k_w, (C, L, E), jnp.float32, -bound_w, bound_w)

    # Classifier: Linear(C*L -> C)
    bound_c = 1.0 / jnp.sqrt(jnp.float32(C * L))
    w_cls = jax.random.uniform(k_wc, (C, C * L), jnp.float32, -bound_c, bound_c)
    b_cls = jax.random.uniform(k_bc, (C,), jnp.float32, -bound_c, bound_c)

    embed = base_model_last_hidden_state(emb_table, input_ids, attention_mask)

    # One-time weight layout prep (outside the jit'd forward — no per-call transpose).
    w_all = prepare_space_weights(w_spaces)

    # block_b=None -> heuristic picks one grid step for these tiny shapes
    # (tiles scale up to thousands of rows for production shapes).
    loss, logits, concept_spaces = space_model_for_seq_classification(
        embed, w_all, w_cls, b_cls, n_concept_spaces=C, n_latent=L)
    jax.block_until_ready((loss, logits, concept_spaces))

    # Pure-JAX reference (same math as the PyTorch forward, labels=None).
    proj_ref = jnp.tanh(jnp.einsum("bse,cle->cbsl", embed, w_spaces))   # [C, B, S, L]
    hidden_ref = jnp.concatenate(
        [proj_ref[c].mean(axis=1) for c in range(C)], axis=-1)          # [B, C*L]
    logits_ref = hidden_ref @ w_cls.T + b_cls                           # [B, C]

    assert logits.dtype == jnp.float32
    assert jnp.allclose(logits, logits_ref, atol=1e-5, rtol=1e-5)
    assert jnp.allclose(concept_spaces, proj_ref, atol=1e-5, rtol=1e-5)
    assert float(loss) == 0.0

    print("KERNEL_OK")
</pallas_src>

<mosaic_0001>
module attributes {stable_mosaic.version = 11 : i64} {
  func.func @_space_proj_kernel(%arg0: i32, %arg1: memref<128x32xf32, #tpu.memory_space<vmem>>, %arg2: memref<32x32xf32, #tpu.memory_space<vmem>>, %arg3: memref<32x2xf32, #tpu.memory_space<vmem>>, %arg4: memref<1x2xf32, #tpu.memory_space<vmem>>, %arg5: memref<2x128x16xf32, #tpu.memory_space<vmem>>, %arg6: memref<1x8x2xf32, #tpu.memory_space<vmem>>) attributes {dimension_semantics = [#tpu.dimension_semantics<parallel>], iteration_bounds = array<i64: 1>, scalar_prefetch = 0 : i64, scratch_operands = 0 : i64, tpu.core_type = #tpu.core_type<tc>, window_params = [{transform_indices = @transform_0, window_bounds = array<i64: 128, 32>}, {pipeline_mode = #tpu.pipeline_mode<synchronous>, transform_indices = @transform_1, window_bounds = array<i64: 32, 32>}, {pipeline_mode = #tpu.pipeline_mode<synchronous>, transform_indices = @transform_2, window_bounds = array<i64: 32, 2>}, {pipeline_mode = #tpu.pipeline_mode<synchronous>, transform_indices = @transform_3, window_bounds = array<i64: 1, 2>}, {transform_indices = @transform_4, window_bounds = array<i64: 2, 128, 16>}, {transform_indices = @transform_5, window_bounds = array<i64: 1, 8, 2>}]} {
    %c0 = arith.constant 0 : index
    %c0_0 = arith.constant 0 : index
    %0 = vector.load %arg1[%c0, %c0_0] : memref<128x32xf32, #tpu.memory_space<vmem>>, vector<128x32xf32>
    %c0_1 = arith.constant 0 : index
    %c0_2 = arith.constant 0 : index
    %1 = vector.load %arg2[%c0_1, %c0_2] : memref<32x32xf32, #tpu.memory_space<vmem>>, vector<32x32xf32>
    %cst = arith.constant dense<0.000000e+00> : vector<128x32xf32>
    %2 = tpu.matmul %0, %1, %cst {dimension_numbers = #tpu.dot_dimension_numbers<[1], [0], [0], [1], [0, 0, 1, 1], [], []>} : vector<128x32xf32>, vector<32x32xf32>, vector<128x32xf32> -> vector<128x32xf32>
    %3 = math.tanh %2 : vector<128x32xf32>
    %4 = vector.extract_strided_slice %3 {offsets = [0, 0], sizes = [128, 16], strides = [1, 1]} : vector<128x32xf32> to vector<128x16xf32>
    %c0_3 = arith.constant 0 : index
    %c0_4 = arith.constant 0 : index
    %c0_5 = arith.constant 0 : index
    %5 = vector.load %arg5[%c0_3, %c0_4, %c0_5] : memref<2x128x16xf32, #tpu.memory_space<vmem>>, vector<1x128x16xf32>
    %6 = vector.shape_cast %5 : vector<1x128x16xf32> to vector<128x16xf32>
    %7 = vector.shape_cast %4 : vector<128x16xf32> to vector<1x128x16xf32>
    tpu.vector_store %arg5[%c0_3, %c0_4, %c0_5], %7 {strides = array<i32>} : memref<2x128x16xf32, #tpu.memory_space<vmem>>, vector<1x128x16xf32>,
    %8 = vector.extract_strided_slice %3 {offsets = [0, 16], sizes = [128, 16], strides = [1, 1]} : vector<128x32xf32> to vector<128x16xf32>
    %c1 = arith.constant 1 : index
    %c0_6 = arith.constant 0 : index
    %c0_7 = arith.constant 0 : index
    %9 = vector.load %arg5[%c1, %c0_6, %c0_7] : memref<2x128x16xf32, #tpu.memory_space<vmem>>, vector<1x128x16xf32>
    %10 = vector.shape_cast %9 : vector<1x128x16xf32> to vector<128x16xf32>
    %11 = vector.shape_cast %8 : vector<128x16xf32> to vector<1x128x16xf32>
    tpu.vector_store %arg5[%c1, %c0_6, %c0_7], %11 {strides = array<i32>} : memref<2x128x16xf32, #tpu.memory_space<vmem>>, vector<1x128x16xf32>,
    %12 = vector.shape_cast %3 : vector<128x32xf32> to vector<8x16x32xf32>
    %cst_8 = arith.constant dense<0.000000e+00> : vector<8x32xf32>
    %13 = vector.multi_reduction <add>, %12, %cst_8 [1] : vector<8x16x32xf32> to vector<8x32xf32>
    %cst_9 = arith.constant 6.250000e-02 : f32
    %14 = vector.broadcast %cst_9 : f32 to vector<8x32xf32>
    %15 = arith.mulf %13, %14 : vector<8x32xf32>
    %c0_10 = arith.constant 0 : index
    %c0_11 = arith.constant 0 : index
    %16 = vector.load %arg3[%c0_10, %c0_11] : memref<32x2xf32, #tpu.memory_space<vmem>>, vector<32x2xf32>
    %cst_12 = arith.constant dense<0.000000e+00> : vector<8x2xf32>
    %17 = tpu.matmul %15, %16, %cst_12 {dimension_numbers = #tpu.dot_dimension_numbers<[1], [0], [0], [1], [0, 0, 1, 1], [], []>} : vector<8x32xf32>, vector<32x2xf32>, vector<8x2xf32> -> vector<8x2xf32>
    %c0_13 = arith.constant 0 : index
    %c0_14 = arith.constant 0 : index
    %18 = vector.load %arg4[%c0_13, %c0_14] : memref<1x2xf32, #tpu.memory_space<vmem>>, vector<1x2xf32>
    %19 = vector.broadcast %18 : vector<1x2xf32> to vector<8x2xf32>
    %20 = arith.addf %17, %19 : vector<8x2xf32>
    %c0_15 = arith.constant 0 : index
    %c0_16 = arith.constant 0 : index
    %c0_17 = arith.constant 0 : index
    %21 = vector.load %arg6[%c0_15, %c0_16, %c0_17] : memref<1x8x2xf32, #tpu.memory_space<vmem>>, vector<1x8x2xf32>
    %22 = vector.shape_cast %21 : vector<1x8x2xf32> to vector<8x2xf32>
    %23 = vector.shape_cast %20 : vector<8x2xf32> to vector<1x8x2xf32>
    tpu.vector_store %arg6[%c0_15, %c0_16, %c0_17], %23 {strides = array<i32>} : memref<1x8x2xf32, #tpu.memory_space<vmem>>, vector<1x8x2xf32>,
    return
  }
  func.func @transform_0(%arg0: i32) -> (i32, i32) {
    %c0_i32 = arith.constant 0 : i32
    %c0_i32_0 = arith.constant 0 : i32
    return %arg0, %c0_i32 : i32, i32
  }
  func.func @transform_1(%arg0: i32) -> (i32, i32) {
    %c0_i32 = arith.constant 0 : i32
    %c0_i32_0 = arith.constant 0 : i32
    %c0_i32_1 = arith.constant 0 : i32
    return %c0_i32, %c0_i32_0 : i32, i32
  }
  func.func @transform_2(%arg0: i32) -> (i32, i32) {
    %c0_i32 = arith.constant 0 : i32
    %c0_i32_0 = arith.constant 0 : i32
    %c0_i32_1 = arith.constant 0 : i32
    return %c0_i32, %c0_i32_0 : i32, i32
  }
  func.func @transform_3(%arg0: i32) -> (i32, i32) {
    %c0_i32 = arith.constant 0 : i32
    %c0_i32_0 = arith.constant 0 : i32
    %c0_i32_1 = arith.constant 0 : i32
    return %c0_i32, %c0_i32_0 : i32, i32
  }
  func.func @transform_4(%arg0: i32) -> (i32, i32, i32) {
    %c0_i32 = arith.constant 0 : i32
    %c0_i32_0 = arith.constant 0 : i32
    %c0_i32_1 = arith.constant 0 : i32
    return %c0_i32, %arg0, %c0_i32_0 : i32, i32, i32
  }
  func.func @transform_5(%arg0: i32) -> (i32, i32, i32) {
    %c0_i32 = arith.constant 0 : i32
    %c0_i32_0 = arith.constant 0 : i32
    %c0_i32_1 = arith.constant 0 : i32
    return %arg0, %c0_i32, %c0_i32_0 : i32, i32, i32
  }
}

</mosaic_0001>

<bundles_post_ra>
// kernel: space_model_for_seq_classification.1
= control target key start
LH: loop header
LB: loop body
LE: loop exit
PB: predicated region body
PF: predicated region fallthrough
CT: control target
= control target key end

     0   :  { %11 = vsyncpa [#allocation3], 0  ;;  %s728_s0 = inlined_call_operand.hbm [shape: f32[128,32], index: 0, kind: input, shape index: {}]   ;;  %s729_s1 = inlined_call_operand.vmem [shape: f32[32,32], index: 1, kind: input, shape index: {}]   ;;  %s730_s2 = inlined_call_operand.vmem [shape: f32[32,2], index: 2, kind: input, shape index: {}]   ;;  %s731_s3 = inlined_call_operand.vmem [shape: f32[1,2], index: 3, kind: input, shape index: {}]   ;;  %s732_s4 = inlined_call_operand.hbm [shape: f32[2,128,16], index: 4, kind: output, shape index: {0}]   ;;  %s733_s5 = inlined_call_operand.vmem [shape: f32[1,8,2], index: 5, kind: output, shape index: {1}]  }
   0x1   :  { %12 = vsyncpa [#allocation4], 0  ;;  %s17_s20 = sshll.u32 %s728_s0, 4  ;;  %s560_s21 = smov [#allocation2]   ;;  %s18_s20 = int_to_ptr.hbm [resolvable:$true] %s17_s20 }
   0x2   :  { %s19_s22 = sshll.u32 %s560_s21, 4  ;;  %s561_s23 = smov 128   ;;  %s20_s22 = int_to_ptr.vmem [resolvable:$true] %s19_s22 }
   0x3   :  { %s562_s24 = smov 8  }
   0x4   :  { %25 = dma.hbm_to_vmem [thread:$0]  %s18_s20, 2048, %s20_s22, [#allocation3], %s561_s23, %s561_s23, %s562_s24  }
   0x5   :  { %556 = dma.done.wait [#allocation3], 2048  }
   0x6   :  { %557 = vsyncadd [#allocation3], 4294965248  ;;  %v55_v0 = vld [vmem:[%s729_s1 + $0x18] sm:$0xff]  ;;  %v54_v1 = vld [vmem:[%s729_s1 + $0x10] sm:$0xff]  ;;  %vm56_vm0 = vcmask 261120   ;;  %vm186_vm1 = vcmask 130048  }
   0x7   :  { %117 = vmatpush.msra.mxu0 %v55_v0  ;;  %458 = vmatpush.msra.mxu1 %v55_v0  ;;  %v53_v2 = vld [vmem:[%s729_s1 + $0x8] sm:$0xff]  ;;  %v52_v3 = vld [vmem:[%s729_s1] sm:$0xff]  ;;  %v42_v6 = vld [vmem:[#allocation2 + $0x30] sm:$0xff]  ;;  %s563_s1 = smov 112   ;;  %vm380_vm2 = vcmask 1041409   ;;  %vm382_vm3 = vcmask 1042434  }
   0x8   :  { %459 = vmatpush.msra.mxu2 %v55_v0  ;;  %460 = vmatpush.msra.mxu3 %v55_v0  ;;  %v36_v4 = vld [vmem:[#allocation2] sm:$0xff]  ;;  %v47_v7 = vld [vmem:[#allocation2 + $0x58] sm:$0xff]  ;;  %v37_v8 = vld [vmem:[#allocation2 + $0x8] sm:$0xff]  ;;  %vm384_vm4 = vcmask 1043459   ;;  %vm386_vm5 = vcmask 1044484   ;;  %vm388_vm6 = vcmask 1045509  }
   0x9   :  { %118 = vmatpush.msra.mxu0 %v54_v1  ;;  %461 = vmatpush.msra.mxu1 %v54_v1  ;;  %v40_v5 = vld [vmem:[#allocation2 + $0x20] sm:$0xff]  ;;  %v41_v9 = vld [vmem:[#allocation2 + $0x28] sm:$0xff]  ;;  %v43_v10 = vld [vmem:[#allocation2 + $0x38] sm:$0xff]  ;;  %vm390_vm7 = vcmask 1046534   ;;  %vm392_vm8 = vcmask 1047559   ;;  %s424_s18 = sshll.u32 %s732_s4, 4  ;;  %s425_s18 = int_to_ptr.hbm [resolvable:$true] %s424_s18 }
   0xa   :  { %462 = vmatpush.msra.mxu2 %v54_v1  ;;  %463 = vmatpush.msra.mxu3 %v54_v1  ;;  %v48_v11 = vld [vmem:[#allocation2 + $0x60] sm:$0xff]  ;;  %v38_v12 = vld [vmem:[#allocation2 + $0x10] sm:$0xff]  ;;  %v49_v14 = vld [vmem:[#allocation2 + $0x68] sm:$0xff]  ;;  %vm416_vm9 = vcmask 15360  }
   0xb   :  { %119 = vmatpush.msra.mxu0 %v53_v2  ;;  %464 = vmatpush.msra.mxu1 %v53_v2  ;;  %v44_v13 = vld [vmem:[#allocation2 + $0x40] sm:$0xff]  ;;  %v39_v15 = vld [vmem:[#allocation2 + $0x18] sm:$0xff]  ;;  %v45_v16 = vld [vmem:[#allocation2 + $0x48] sm:$0xff] }
   0xc   :  { %465 = vmatpush.msra.mxu2 %v53_v2  ;;  %466 = vmatpush.msra.mxu3 %v53_v2  ;;  %v50_v17 = vld [vmem:[#allocation2 + $0x70] sm:$0xff]  ;;  %v51_v19 = vld [vmem:[#allocation2 + $0x78] sm:$0xff]  ;;  %v365_v43 = vld [vmem:[%s730_s2 + $0x8] sm:$0xff] }
   0xd   :  { %120 = vmatpush.msra.mxu0 %v52_v3  ;;  %467 = vmatpush.msra.mxu1 %v52_v3  ;;  %v46_v18 = vld [vmem:[#allocation2 + $0x50] sm:$0xff]  ;;  %v367_v35 = vld [vmem:[%s730_s2 + $0x18] sm:$0xff]  ;;  %v364_v44 = vld [vmem:[%s730_s2] sm:$0xff] }
   0xe   :  { %468 = vmatpush.msra.mxu2 %v52_v3  ;;  %469 = vmatpush.msra.mxu3 %v52_v3  ;;  %v366_v36 = vld [vmem:[%s730_s2 + $0x10] sm:$0xff]  ;;  %s564_s2 = smov [#allocation5]  }
   0xf   :  { %441 = vmatmul.msk.f32.vlgmr.msra.gmra.mxu0 %vm56_vm0, %v36_v4  ;;  %445 = vmatmul.msk.f32.vlgmr.msra.gmra.mxu1 %vm56_vm0, %v40_v5  ;;  %s422_s15 = sshll.u32 %s564_s2, 4  ;;  %s423_s15 = int_to_ptr.vmem [resolvable:$true] %s422_s15 }
  0x10   :  { %447 = vmatmul.msk.f32.vlgmr.msra.gmra.mxu2 %vm56_vm0, %v42_v6  ;;  %452 = vmatmul.msk.f32.vlgmr.msra.gmra.mxu3 %vm56_vm0, %v47_v7 }
  0x11   :  { %408 = vmatpush.msrb.mxu1 %v367_v35 }
  0x13   :  { %409 = vmatpush.msrb.mxu1 %v366_v36 }
  0x15   :  { %410 = vmatpush.msrb.mxu1 %v365_v43 }
  0x17   :  { %442 = vmatmul.msk.f32.gmra.mxu0 %vm56_vm0, %v37_v8  ;;  %446 = vmatmul.msk.f32.gmra.mxu1 %vm56_vm0, %v41_v9 }
  0x18   :  { %448 = vmatmul.msk.f32.gmra.mxu2 %vm56_vm0, %v43_v10  ;;  %453 = vmatmul.msk.f32.gmra.mxu3 %vm56_vm0, %v48_v11 }
  0x19   :  { %411 = vmatpush.msrb.mxu1 %v364_v44 }
  0x1f   :  { %443 = vmatmul.msk.f32.gmra.mxu0 %vm56_vm0, %v38_v12 }
  0x20   :  { %449 = vmatmul.msk.f32.gmra.mxu2 %vm56_vm0, %v44_v13  ;;  %454 = vmatmul.msk.f32.gmra.mxu3 %vm56_vm0, %v49_v14 }
  0x27   :  { %444 = vmatmul.msk.f32.gmra.mxu0 %vm56_vm0, %v39_v15 }
  0x28   :  { %450 = vmatmul.msk.f32.gmra.mxu2 %vm56_vm0, %v45_v16  ;;  %455 = vmatmul.msk.f32.gmra.mxu3 %vm56_vm0, %v50_v17 }
  0x30   :  { %451 = vmatmul.msk.f32.gmra.mxu2 %vm56_vm0, %v46_v18  ;;  %456 = vmatmul.msk.f32.gmra.mxu3 %vm56_vm0, %v51_v19 }
  0x8c   :  { %v122_v20 = vpop.f32.mrf.mxu0  ;;  %v134_v21 = vpop.f32.mrf.mxu1 }
  0x8d   :  { %476 = vtanh.f32 %v122_v20 }
  0x8e   :  { %478 = vtanh.f32 %v134_v21 }
  0x93   :  { %v477_v22 = vpop.eup %476  ;;  %v140_v23 = vpop.f32.mrf.mxu2 }
  0x94   :  { %v155_v24 = vpop.f32.mrf.mxu3  ;;  %v479_v25 = vpop.eup %478  ;;  %187 = vst.msk [vmem:[#allocation5] sm:$0xff] %vm186_vm1, %v477_v22  ;;  %480 = vtanh.f32 %v140_v23  ;;  %219 = vrot.lane.b32.xlu0 %v477_v22, %s563_s1  ;;  %v284_v39 = vsel %vm56_vm0, %v477_v22, 0.0 }
  0x95   :  { %v125_v26 = vpop.f32.mrf.mxu0  ;;  %v137_v27 = vpop.f32.mrf.mxu1  ;;  %191 = vst.msk [vmem:[#allocation5 + $0x20] sm:$0xff] %vm186_vm1, %v479_v25  ;;  %482 = vtanh.f32 %v155_v24  ;;  %227 = vrot.lane.b32.xlu2 %v479_v25, %s563_s1  ;;  %v302_v47 = vsel %vm56_vm0, %v479_v25, 0.0 }
  0x96   :  { %484 = vtanh.f32 %v125_v26 }
  0x97   :  { %486 = vtanh.f32 %v137_v27 }
  0x9a   :  { %v481_v28 = vpop.eup %480 }
  0x9b   :  { %v633_v29 = vpop.eup %482  ;;  %193 = vst.msk [vmem:[#allocation5 + $0x30] sm:$0xff] %vm186_vm1, %v481_v28  ;;  %v143_v30 = vpop.f32.mrf.mxu2  ;;  %v311_v53 = vsel %vm56_vm0, %v481_v28, 0.0 }
  0x9c   :  { %v158_v31 = vpop.f32.mrf.mxu3  ;;  %v485_v32 = vpop.eup %484  ;;  %198 = vst.msk [vmem:[#allocation5 + $0x58] sm:$0xff] %vm186_vm1, %v633_v29  ;;  %488 = vtanh.f32 %v143_v30  ;;  %231 = vrot.lane.b32.xlu0 %v481_v28, %s563_s1  ;;  %v330_v30 = vsel %vm56_vm0, %v633_v29, 0.0 }
  0x9d   :  { %v128_v33 = vpop.f32.mrf.mxu0  ;;  %v487_v34 = vpop.eup %486  ;;  %188 = vst.msk [vmem:[#allocation5 + $0x8] sm:$0xff] %vm186_vm1, %v485_v32  ;;  %490 = vtanh.f32 %v158_v31  ;;  %241 = vrot.lane.b32.xlu2 %v633_v29, %s563_s1  ;;  %v285_v40 = vsel %vm56_vm0, %v485_v32, 0.0 }
  0x9e   :  { %192 = vst.msk [vmem:[#allocation5 + $0x28] sm:$0xff] %vm186_vm1, %v487_v34  ;;  %492 = vtanh.f32 %v128_v33  ;;  %v286_v48 = vadd.f32 %v285_v40, %v284_v39  ;;  %v303_v49 = vsel %vm56_vm0, %v487_v34, 0.0 }
  0x9f   :  { %v304_v51 = vadd.f32 %v303_v49, %v302_v47 }
  0xa0   :  { %v287_v54 = vrot.slane %v286_v48, 4 }
  0xa1   :  { %v305_v62 = vrot.slane %v304_v51, 4 }
  0xa2   :  { %v489_v37 = vpop.eup %488  ;;  %v288_v0 = vadd.f32 %v287_v54, %v286_v48 }
  0xa3   :  { %v491_v38 = vpop.eup %490  ;;  %194 = vst.msk [vmem:[#allocation5 + $0x38] sm:$0xff] %vm186_vm1, %v489_v37  ;;  %233 = vrot.lane.b32.xlu1 %v489_v37, %s563_s1  ;;  %v146_v42 = vpop.f32.mrf.mxu2  ;;  %v312_v50 = vsel %vm56_vm0, %v489_v37, 0.0  ;;  %v306_v6 = vadd.f32 %v305_v62, %v304_v51 }
  0xa4   :  { %v161_v41 = vpop.f32.mrf.mxu3  ;;  %v493_v45 = vpop.eup %492  ;;  %199 = vst.msk [vmem:[#allocation5 + $0x60] sm:$0xff] %vm186_vm1, %v491_v38  ;;  %221 = vrot.lane.b32.xlu0 %v485_v32, %s563_s1  ;;  %v313_v56 = vadd.f32 %v312_v50, %v311_v53  ;;  %v338_v1 = vsel %vm56_vm0, %v491_v38, 0.0  ;;  %v289_v8 = vrot.slane %v288_v0, 2 }
  0xa5   :  { %494 = vtanh.f32 %v161_v41  ;;  %v131_v46 = vpop.f32.mrf.mxu0  ;;  %189 = vst.msk [vmem:[#allocation5 + $0x10] sm:$0xff] %vm186_vm1, %v493_v45  ;;  %229 = vrot.lane.b32.xlu2 %v487_v34, %s563_s1  ;;  %v293_v57 = vsel %vm56_vm0, %v493_v45, 0.0  ;;  %v307_v19 = vrot.slane %v306_v6, 2 }
  0xa6   :  { %496 = vtanh.f32 %v146_v42  ;;  %v314_v3 = vrot.slane %v313_v56, 4  ;;  %v290_v20 = vadd.f32 %v289_v8, %v288_v0 }
  0xa7   :  { %498 = vtanh.f32 %v131_v46  ;;  %v308_v27 = vadd.f32 %v307_v19, %v306_v6 }
  0xa8   :  { %v315_v11 = vadd.f32 %v314_v3, %v313_v56  ;;  %v291_v31 = vrot.slane %v290_v20, 1 }
  0xa9   :  { %v309_v41 = vrot.slane %v308_v27, 1 }
  0xaa   :  { %v316_v23 = vrot.slane %v315_v11, 2  ;;  %v292_v44 = vadd.f32 %v291_v31, %v290_v20 }
  0xab   :  { %v666_v52 = vpop.eup %494  ;;  %v149_v58 = vpop.f32.mrf.mxu2  ;;  %223 = vrot.lane.b32.xlu1 %v493_v45, %s563_s1  ;;  %v310_v51 = vadd.f32 %v309_v41, %v308_v27 }
  0xac   :  { %v497_v55 = vpop.eup %496  ;;  %200 = vst.msk [vmem:[#allocation5 + $0x68] sm:$0xff] %vm186_vm1, %v666_v52  ;;  %v164_v59 = vpop.f32.mrf.mxu3  ;;  %v339_v61 = vsel %vm56_vm0, %v666_v52, 0.0  ;;  %500 = vtanh.f32 %v149_v58  ;;  %243 = vrot.lane.b32.xlu0 %v491_v38, %s563_s1  ;;  %v317_v35 = vadd.f32 %v316_v23, %v315_v11 }
  0xad   :  { %v499_v60 = vpop.eup %498  ;;  %195 = vst.msk [vmem:[#allocation5 + $0x40] sm:$0xff] %vm186_vm1, %v497_v55  ;;  %502 = vtanh.f32 %v164_v59  ;;  %235 = vrot.lane.b32.xlu2 %v497_v55, %s563_s1  ;;  %v340_v4 = vadd.f32 %v339_v61, %v338_v1  ;;  %v320_v12 = vsel %vm56_vm0, %v497_v55, 0.0  ;;  %v356_v55 = vmul.f32 0.0625, %v292_v44 }
  0xae   :  { %190 = vst.msk [vmem:[#allocation5 + $0x18] sm:$0xff] %vm186_vm1, %v499_v60  ;;  %v294_v63 = vsel %vm56_vm0, %v499_v60, 0.0  ;;  %v318_v48 = vrot.slane %v317_v35, 1 }
  0xaf   :  { %v295_v2 = vadd.f32 %v294_v63, %v293_v57  ;;  %v341_v16 = vrot.slane %v340_v4, 4  ;;  %v358_v63 = vmul.f32 0.0625, %v310_v51 }
  0xb0   :  { %v319_v59 = vadd.f32 %v318_v48, %v317_v35 }
  0xb1   :  { %v296_v5 = vrot.slane %v295_v2, 4  ;;  %v342_v24 = vadd.f32 %v341_v16, %v340_v4 }
  0xb2   :  { %v501_v7 = vpop.eup %500  ;;  %v359_v6 = vmul.f32 0.0625, %v319_v59 }
  0xb3   :  { %v297_v9 = vadd.f32 %v296_v5, %v295_v2  ;;  %v503_v10 = vpop.eup %502  ;;  %196 = vst.msk [vmem:[#allocation5 + $0x48] sm:$0xff] %vm186_vm1, %v501_v7  ;;  %v321_v13 = vsel %vm56_vm0, %v501_v7, 0.0  ;;  %v152_v14 = vpop.f32.mrf.mxu2  ;;  %225 = vrot.lane.b32.xlu1 %v499_v60, %s563_s1  ;;  %v343_v36 = vrot.slane %v342_v24, 2 }
  0xb4   :  { %v167_v15 = vpop.f32.mrf.mxu3  ;;  %v322_v18 = vadd.f32 %v321_v13, %v320_v12  ;;  %201 = vst.msk [vmem:[#allocation5 + $0x70] sm:$0xff] %vm186_vm1, %v503_v10  ;;  %504 = vtanh.f32 %v152_v14  ;;  %237 = vrot.lane.b32.xlu0 %v501_v7, %s563_s1  ;;  %v347_v37 = vsel %vm56_vm0, %v503_v10, 0.0 }
  0xb5   :  { %v298_v17 = vrot.slane %v297_v9, 2  ;;  %506 = vtanh.f32 %v167_v15  ;;  %247 = vrot.lane.b32.xlu2 %v503_v10, %s563_s1  ;;  %v344_v46 = vadd.f32 %v343_v36, %v342_v24 }
  0xb6   :  { %v323_v22 = vrot.slane %v322_v18, 4 }
  0xb7   :  { %v299_v21 = vadd.f32 %v298_v17, %v297_v9  ;;  %v345_v57 = vrot.slane %v344_v46, 1 }
  0xb8   :  { %v324_v26 = vadd.f32 %v323_v22, %v322_v18 }
  0xb9   :  { %v300_v25 = vrot.slane %v299_v21, 1  ;;  %v346_v1 = vadd.f32 %v345_v57, %v344_v46 }
  0xba   :  { %v505_v28 = vpop.eup %504  ;;  %v325_v32 = vrot.slane %v324_v26, 2 }
  0xbb   :  { %v507_v33 = vpop.eup %506  ;;  %197 = vst.msk [vmem:[#allocation5 + $0x50] sm:$0xff] %vm186_vm1, %v505_v28  ;;  %v329_v34 = vsel %vm56_vm0, %v505_v28, 0.0  ;;  %239 = vrot.lane.b32.xlu1 %v505_v28, %s563_s1  ;;  %v301_v39 = vadd.f32 %v300_v25, %v299_v21  ;;  %v362_v9 = vmul.f32 0.0625, %v346_v1 }
  0xbc   :  { %v331_v38 = vadd.f32 %v330_v30, %v329_v34  ;;  %202 = vst.msk [vmem:[#allocation5 + $0x78] sm:$0xff] %vm186_vm1, %v507_v33  ;;  %249 = vrot.lane.b32.xlu0 %v507_v33, %s563_s1  ;;  %v326_v29 = vadd.f32 %v325_v32, %v324_v26  ;;  %v348_v40 = vsel %vm56_vm0, %v507_v33, 0.0  ;;  %v475_v32 = vld [vmem:[%s731_s3] ss:$0 sm:$0xff] }
  0xbd   :  { %v349_v42 = vadd.f32 %v348_v40, %v347_v37  ;;  %v357_v50 = vmul.f32 0.0625, %v301_v39 }
  0xbe   :  { %v332_v43 = vrot.slane %v331_v38, 4  ;;  %v327_v45 = vrot.slane %v326_v29, 1 }
  0xbf   :  { %v350_v47 = vrot.slane %v349_v42, 4  ;;  %v381_v61 = vsel %vm380_vm2, %v357_v50, %v356_v55 }
  0xc0   :  { %v333_v49 = vadd.f32 %v332_v43, %v331_v38  ;;  %v328_v56 = vadd.f32 %v327_v45, %v326_v29  ;;  %v383_v4 = vsel %vm382_vm3, %v358_v63, %v381_v61 }
  0xc1   :  { %v351_v53 = vadd.f32 %v350_v47, %v349_v42  ;;  %v385_v8 = vsel %vm384_vm4, %v359_v6, %v383_v4 }
  0xc2   :  { %v334_v54 = vrot.slane %v333_v49, 2  ;;  %v360_v3 = vmul.f32 0.0625, %v328_v56 }
  0xc3   :  { %245 = vrot.lane.b32.xlu1 %v666_v52, %s563_s1  ;;  %v352_v58 = vrot.slane %v351_v53, 2 }
  0xc4   :  { %v335_v60 = vadd.f32 %v334_v54, %v333_v49  ;;  %v387_v10 = vsel %vm386_vm5, %v360_v3, %v385_v8 }
  0xc5   :  { %v353_v62 = vadd.f32 %v352_v58, %v351_v53 }
  0xc6   :  { %v336_v0 = vrot.slane %v335_v60, 1 }
  0xc7   :  { %v354_v2 = vrot.slane %v353_v62, 1 }
  0xc8   :  { %v337_v5 = vadd.f32 %v336_v0, %v335_v60 }
  0xc9   :  { %v355_v7 = vadd.f32 %v354_v2, %v353_v62 }
  0xca   :  { %v361_v52 = vmul.f32 0.0625, %v337_v5 }
  0xcb   :  { %v363_v11 = vmul.f32 0.0625, %v355_v7 }
  0xcc   :  { %v389_v12 = vsel %vm388_vm6, %v361_v52, %v387_v10 }
  0xcd   :  { %v391_v13 = vsel %vm390_vm7, %v362_v9, %v389_v12 }
  0xce   :  { %v393_v14 = vsel %vm392_vm8, %v363_v11, %v391_v13 }
  0xcf   :  { %457 = vmatmul.msk.f32.vlgmr.msrb.gmra.mxu1 %vm56_vm0, %v393_v14 }
  0xef   :  { %v228_v15 = vpop.permute.xlu2 %227 }
  0xf0   :  { %272 = vst.msk [vmem:[#allocation5 + $0xa0] sm:$0xff] %vm186_vm1, %v228_v15 }
  0xf7   :  { %v242_v16 = vpop.permute.xlu2 %241 }
  0xf8   :  { %279 = vst.msk [vmem:[#allocation5 + $0xd8] sm:$0xff] %vm186_vm1, %v242_v16 }
  0xff   :  { %v230_v17 = vpop.permute.xlu2 %229 }
 0x100   :  { %273 = vst.msk [vmem:[#allocation5 + $0xa8] sm:$0xff] %vm186_vm1, %v230_v17 }
 0x106   :  { %v220_v18 = vpop.permute.xlu0 %219 }
 0x107   :  { %v236_v19 = vpop.permute.xlu2 %235  ;;  %268 = vst.msk [vmem:[#allocation5 + $0x80] sm:$0xff] %vm186_vm1, %v220_v18 }
 0x108   :  { %276 = vst.msk [vmem:[#allocation5 + $0xc0] sm:$0xff] %vm186_vm1, %v236_v19 }
 0x10e   :  { %v232_v20 = vpop.permute.xlu0 %231 }
 0x10f   :  { %v248_v21 = vpop.permute.xlu2 %247  ;;  %274 = vst.msk [vmem:[#allocation5 + $0xb0] sm:$0xff] %vm186_vm1, %v232_v20 }
 0x110   :  { %282 = vst.msk [vmem:[#allocation5 + $0xf0] sm:$0xff] %vm186_vm1, %v248_v21 }
 0x115   :  { %v234_v22 = vpop.permute.xlu1 %233 }
 0x116   :  { %275 = vst.msk [vmem:[#allocation5 + $0xb8] sm:$0xff] %vm186_vm1, %v234_v22  ;;  %v222_v23 = vpop.permute.xlu0 %221 }
 0x117   :  { %269 = vst.msk [vmem:[#allocation5 + $0x88] sm:$0xff] %vm186_vm1, %v222_v23 }
 0x11d   :  { %v224_v24 = vpop.permute.xlu1 %223 }
 0x11e   :  { %270 = vst.msk [vmem:[#allocation5 + $0x90] sm:$0xff] %vm186_vm1, %v224_v24  ;;  %v244_v25 = vpop.permute.xlu0 %243 }
 0x11f   :  { %280 = vst.msk [vmem:[#allocation5 + $0xe0] sm:$0xff] %vm186_vm1, %v244_v25 }
 0x125   :  { %v226_v26 = vpop.permute.xlu1 %225 }
 0x126   :  { %271 = vst.msk [vmem:[#allocation5 + $0x98] sm:$0xff] %vm186_vm1, %v226_v26  ;;  %v238_v27 = vpop.permute.xlu0 %237 }
 0x127   :  { %277 = vst.msk [vmem:[#allocation5 + $0xc8] sm:$0xff] %vm186_vm1, %v238_v27 }
 0x12d   :  { %v240_v28 = vpop.permute.xlu1 %239 }
 0x12e   :  { %278 = vst.msk [vmem:[#allocation5 + $0xd0] sm:$0xff] %vm186_vm1, %v240_v28  ;;  %v250_v30 = vpop.permute.xlu0 %249 }
 0x12f   :  { %283 = vst.msk [vmem:[#allocation5 + $0xf8] sm:$0xff] %vm186_vm1, %v250_v30 }
 0x135   :  { %v246_v31 = vpop.permute.xlu1 %245 }
 0x136   :  { %281 = vst.msk [vmem:[#allocation5 + $0xe8] sm:$0xff] %vm186_vm1, %v246_v31 }
 0x137   :  { %430 = dma.vmem_to_hbm [thread:$0]  %s423_s15, 4096, %s425_s18, [#allocation4], %s561_s23, %s561_s23, %s562_s24  }
 0x14c   :  { %v413_v33 = vpop.f32.mrf.mxu1 }
 0x14d   :  { %v414_v34 = vadd.f32 %v475_v32, %v413_v33 }
 0x14f   :  { %417 = vst.msk [vmem:[%s733_s5] sm:$0xff] %vm416_vm9, %v414_v34 }
 0x150   :  { %558 = dma.done.wait [#allocation4], 4096  }
 0x151   :  { %559 = vsyncadd [#allocation4], 4294963200 }
 0x152   :  { %439 = vsyncpa [#allocation3], 1 }
 0x153   :  { %440 = vsyncpa [#allocation4], 1 }

</bundles_post_ra>
